<compile_context>
chip_gen: v7x
topology: tpu7x:2x2x1
jax: 0.10.0
libtpu: 0.0.40
codegen_flags: <defaults>
</compile_context>

<pallas_src>
import functools

import jax
import jax.numpy as jnp
from jax.experimental import pallas as pl
from jax.experimental.pallas import tpu as pltpu


def _round_up(x, m):
    return ((x + m - 1) // m) * m


def _head_kernel(dims, pad_n, w_offs, out_rows,
                 x_ref, w_ref, b_ref, bl_ref, out_ref):
    """Fused MLP on one batch tile.

    dims     : (input_dim, hidden..., out_dim)            -- static ints
    pad_n    : lane padding (>=128) of the param slabs    -- static
    w_offs   : row offset of each layer's block in w_ref  -- static
    out_rows : sublane-padded output rows = round_up(out_dim, 8)

    x_ref  : (tb, input_dim)             activations
    w_ref  : (total_rows, pad_n)         packed, zero-padded weights
    b_ref  : (max(num_hidden,1), pad_n)  packed hidden-layer biases
    bl_ref : (out_rows, 1)               last-layer bias column (zero-padded)
    out_ref: (out_rows, tb)              transposed output (dense stores)
    """
    num_layers = len(dims) - 1

    h = x_ref[...]                       # (tb, cur_w)
    cur_w = dims[0]

    # Hidden layers: h = relu(h @ W_i + b_i), all padded to pad_n lanes.
    # Padding columns stay exactly 0 (zero weights, zero bias, relu(0)=0).
    for i in range(num_layers - 1):
        w = w_ref[w_offs[i]:w_offs[i] + cur_w, :]        # (cur_w, pad_n)
        h = jnp.dot(h, w, preferred_element_type=jnp.float32)
        h = jnp.maximum(h + b_ref[i:i + 1, :], 0.0)      # (1,pad_n) broadcast
        cur_w = pad_n

    # Last layer, computed transposed: (out_rows, tb) = W_last @ h^T.
    wl = w_ref[w_offs[-1]:w_offs[-1] + out_rows, :cur_w]  # (out_rows, cur_w)
    o = jax.lax.dot_general(
        wl, h,
        dimension_numbers=(((1,), (1,)), ((), ())),       # contract features
        preferred_element_type=jnp.float32,
    )                                                     # (out_rows, tb)
    out_ref[...] = (o + bl_ref[...]).astype(out_ref.dtype)


def pack_head_params(weights, biases):
    """Pack torch-layout params into lane-aligned slabs.

    weights[i]: (out_i, in_i) float32 (torch Linear layout)
    biases[i] : (out_i,)      float32
    """
    num_layers = len(weights)
    dims = [int(weights[0].shape[1])] + [int(w.shape[0]) for w in weights]
    last_in = int(weights[-1].shape[1])
    pad_n = max(128, _round_up(max(list(dims[1:]) + [last_in]), 128))
    out_rows = _round_up(dims[-1], 8)

    w_blocks, w_offs, off = [], [], 0
    for i, w in enumerate(weights):
        out_i, in_i = int(w.shape[0]), int(w.shape[1])
        if i < num_layers - 1:
            # Hidden layer: stored transposed (in, out), zero-padded.
            rows = _round_up(in_i, 8) if i == 0 else pad_n
            blk = jnp.zeros((rows, pad_n), jnp.float32)
            blk = blk.at[:in_i, :out_i].set(w.T.astype(jnp.float32))
        else:
            # Last layer: stored as (out, in) so the kernel emits a
            # transposed, lane/sublane-dense (out_rows, tb) result.
            rows = out_rows
            blk = jnp.zeros((rows, pad_n), jnp.float32)
            blk = blk.at[:out_i, :in_i].set(w.astype(jnp.float32))
        w_offs.append(off)
        w_blocks.append(blk)
        off += rows
    w_slab = jnp.concatenate(w_blocks, axis=0)            # (total_rows, pad_n)

    num_hidden = num_layers - 1
    b_slab = jnp.zeros((max(num_hidden, 1), pad_n), jnp.float32)
    for i in range(num_hidden):
        b_slab = b_slab.at[i, :int(weights[i].shape[0])].set(
            biases[i].astype(jnp.float32))
    b_last = jnp.zeros((out_rows, 1), jnp.float32)
    b_last = b_last.at[:dims[-1], 0].set(biases[-1].astype(jnp.float32))

    return dict(w_slab=w_slab, b_slab=b_slab, b_last=b_last,
                dims=tuple(dims), pad_n=pad_n, w_offs=tuple(w_offs),
                out_rows=out_rows)


def _pick_batch_tile(B):
    """Largest 128-aligned divisor tile that still gives >=2 grid steps."""
    for t in (4096, 2048, 1024, 512, 256, 128):
        if B % t == 0 and B // t >= 2:
            return t
    return B


def head_forward(x, packed, *, batch_tile=None):
    """Head forward pass: x [B, input_dim] -> [B, output_size]."""
    B, in_dim = x.shape
    dims, pad_n, w_offs = packed["dims"], packed["pad_n"], packed["w_offs"]
    out_rows = packed["out_rows"]
    assert in_dim == dims[0], (in_dim, dims)
    out_dim = dims[-1]

    tb = batch_tile if batch_tile is not None else _pick_batch_tile(B)
    assert tb == B or (B % tb == 0 and tb % 128 == 0), (
        "batch_tile must equal B or be a 128-aligned divisor of B")

    w_slab, b_slab, b_last = packed["w_slab"], packed["b_slab"], packed["b_last"]
    kernel = functools.partial(_head_kernel, dims, pad_n, w_offs, out_rows)

    flops = int(2 * B * sum(dims[i] * dims[i + 1] for i in range(len(dims) - 1)))
    bytes_accessed = int(x.size * x.dtype.itemsize
                         + B * out_dim * x.dtype.itemsize
                         + (w_slab.size + b_slab.size + b_last.size) * 4)

    out_t = pl.pallas_call(
        kernel,
        out_shape=jax.ShapeDtypeStruct((out_rows, B), x.dtype),
        grid=(B // tb,),
        in_specs=[
            pl.BlockSpec((tb, in_dim), lambda i: (i, 0)),          # x tile
            pl.BlockSpec(w_slab.shape, lambda i: (0, 0)),          # weight slab
            pl.BlockSpec(b_slab.shape, lambda i: (0, 0)),          # hidden biases
            pl.BlockSpec(b_last.shape, lambda i: (0, 0)),          # last bias
        ],
        out_specs=pl.BlockSpec((out_rows, tb), lambda i: (0, i)),
        compiler_params=pltpu.CompilerParams(
            dimension_semantics=("parallel",)),
        cost_estimate=pl.CostEstimate(flops=flops, transcendentals=0,
                                      bytes_accessed=bytes_accessed),
    )(x, w_slab, b_slab, b_last)

    # Drop sublane padding and transpose back to (B, out_dim).
    return jnp.transpose(out_t[:out_dim, :])


def init_head_params(key, input_dim, layer_sizes, output_size):
    """Deterministic init with torch Linear layout: W (out, in), b (out,)."""
    dims = [input_dim] + list(layer_sizes) + [output_size]
    weights, biases = [], []
    for i in range(len(dims) - 1):
        key, wk, bk = jax.random.split(key, 3)
        fan_in, fan_out = dims[i], dims[i + 1]
        std = (2.0 / fan_in) ** 0.5
        w = std * jax.random.normal(wk, (fan_out, fan_in), dtype=jnp.float32)
        b = 0.1 * jax.random.normal(bk, (fan_out,), dtype=jnp.float32)
        weights.append(w)
        biases.append(b)
    return weights, biases


def head_reference(x, weights, biases):
    """Plain-JAX reference (torch-layout weights)."""
    h = x
    n = len(weights)
    for i, (w, b) in enumerate(zip(weights, biases)):
        h = h @ w.T + b
        if i != n - 1:
            h = jnp.maximum(h, 0.0)
    return h


if __name__ == "__main__":
    key = jax.random.PRNGKey(0)

    # Head(input_dim=32, layer_sizes=[64, 32], output_size=1, activation=ReLU)
    input_dim, layer_sizes, output_size = 32, [64, 32], 1

    key, pk = jax.random.split(key)
    weights, biases = init_head_params(pk, input_dim, layer_sizes, output_size)
    packed = pack_head_params(weights, biases)

    # Small batch (tb == B fallback path, single grid step).
    key, xk = jax.random.split(key)
    x_small = jax.random.normal(xk, (8, input_dim), dtype=jnp.float32)
    out_small = jax.block_until_ready(head_forward(x_small, packed))
    ref_small = head_reference(x_small, weights, biases)
    assert out_small.shape == (8, output_size), out_small.shape
    assert jnp.allclose(out_small, ref_small, atol=1e-3, rtol=1e-3), \
        "small-batch mismatch vs reference"

    # Larger batch: exercises 512-row tiling (2 grid steps), pipelining and
    # dense (unmasked) output stores.
    key, xk2 = jax.random.split(key)
    x_big = jax.random.normal(xk2, (1024, input_dim), dtype=jnp.float32)
    out_big = jax.block_until_ready(head_forward(x_big, packed))
    ref_big = head_reference(x_big, weights, biases)
    assert out_big.shape == (1024, output_size), out_big.shape
    assert jnp.allclose(out_big, ref_big, atol=1e-3, rtol=1e-3), \
        "large-batch mismatch vs reference"

    print("KERNEL_OK")
</pallas_src>

<mosaic_0001>
module attributes {stable_mosaic.version = 11 : i64} {
  func.func @_head_kernel(%arg0: i32, %arg1: memref<8x32xf32, #tpu.memory_space<vmem>>, %arg2: memref<168x128xf32, #tpu.memory_space<vmem>>, %arg3: memref<2x128xf32, #tpu.memory_space<vmem>>, %arg4: memref<8x1xf32, #tpu.memory_space<vmem>>, %arg5: memref<8x8xf32, #tpu.memory_space<vmem>>) attributes {dimension_semantics = [#tpu.dimension_semantics<parallel>], iteration_bounds = array<i64: 1>, scalar_prefetch = 0 : i64, scratch_operands = 0 : i64, tpu.core_type = #tpu.core_type<tc>, window_params = [{transform_indices = @transform_0, window_bounds = array<i64: 8, 32>}, {pipeline_mode = #tpu.pipeline_mode<synchronous>, transform_indices = @transform_1, window_bounds = array<i64: 168, 128>}, {pipeline_mode = #tpu.pipeline_mode<synchronous>, transform_indices = @transform_2, window_bounds = array<i64: 2, 128>}, {pipeline_mode = #tpu.pipeline_mode<synchronous>, transform_indices = @transform_3, window_bounds = array<i64: 8, 1>}, {transform_indices = @transform_4, window_bounds = array<i64: 8, 8>}]} {
    %c0 = arith.constant 0 : index
    %c0_0 = arith.constant 0 : index
    %0 = vector.load %arg1[%c0, %c0_0] : memref<8x32xf32, #tpu.memory_space<vmem>>, vector<8x32xf32>
    %c0_1 = arith.constant 0 : index
    %c0_2 = arith.constant 0 : index
    %1 = vector.load %arg2[%c0_1, %c0_2] : memref<168x128xf32, #tpu.memory_space<vmem>>, vector<32x128xf32>
    %cst = arith.constant dense<0.000000e+00> : vector<8x128xf32>
    %2 = tpu.matmul %0, %1, %cst {dimension_numbers = #tpu.dot_dimension_numbers<[1], [0], [0], [1], [0, 0, 1, 1], [], []>} : vector<8x32xf32>, vector<32x128xf32>, vector<8x128xf32> -> vector<8x128xf32>
    %c0_3 = arith.constant 0 : index
    %c0_4 = arith.constant 0 : index
    %3 = vector.load %arg3[%c0_3, %c0_4] : memref<2x128xf32, #tpu.memory_space<vmem>>, vector<1x128xf32>
    %4 = vector.broadcast %3 : vector<1x128xf32> to vector<8x128xf32>
    %5 = arith.addf %2, %4 : vector<8x128xf32>
    %cst_5 = arith.constant 0.000000e+00 : f32
    %6 = vector.broadcast %cst_5 : f32 to vector<8x128xf32>
    %7 = arith.maximumf %5, %6 : vector<8x128xf32>
    %c32 = arith.constant 32 : index
    %c0_6 = arith.constant 0 : index
    %8 = vector.load %arg2[%c32, %c0_6] : memref<168x128xf32, #tpu.memory_space<vmem>>, vector<128x128xf32>
    %cst_7 = arith.constant dense<0.000000e+00> : vector<8x128xf32>
    %9 = tpu.matmul %7, %8, %cst_7 {dimension_numbers = #tpu.dot_dimension_numbers<[1], [0], [0], [1], [0, 0, 1, 1], [], []>} : vector<8x128xf32>, vector<128x128xf32>, vector<8x128xf32> -> vector<8x128xf32>
    %c1 = arith.constant 1 : index
    %c0_8 = arith.constant 0 : index
    %10 = vector.load %arg3[%c1, %c0_8] : memref<2x128xf32, #tpu.memory_space<vmem>>, vector<1x128xf32>
    %11 = vector.broadcast %10 : vector<1x128xf32> to vector<8x128xf32>
    %12 = arith.addf %9, %11 : vector<8x128xf32>
    %cst_9 = arith.constant 0.000000e+00 : f32
    %13 = vector.broadcast %cst_9 : f32 to vector<8x128xf32>
    %14 = arith.maximumf %12, %13 : vector<8x128xf32>
    %c160 = arith.constant 160 : index
    %c0_10 = arith.constant 0 : index
    %15 = vector.load %arg2[%c160, %c0_10] : memref<168x128xf32, #tpu.memory_space<vmem>>, vector<8x128xf32>
    %cst_11 = arith.constant dense<0.000000e+00> : vector<8x8xf32>
    %16 = tpu.matmul %15, %14, %cst_11 {dimension_numbers = #tpu.dot_dimension_numbers<[1], [1], [0], [0], [0, 0, 1, 0], [], []>} : vector<8x128xf32>, vector<8x128xf32>, vector<8x8xf32> -> vector<8x8xf32>
    %c0_12 = arith.constant 0 : index
    %c0_13 = arith.constant 0 : index
    %17 = vector.load %arg4[%c0_12, %c0_13] : memref<8x1xf32, #tpu.memory_space<vmem>>, vector<8x1xf32>
    %18 = vector.broadcast %17 : vector<8x1xf32> to vector<8x8xf32>
    %19 = arith.addf %16, %18 : vector<8x8xf32>
    %c0_14 = arith.constant 0 : index
    %c0_15 = arith.constant 0 : index
    %20 = vector.load %arg5[%c0_14, %c0_15] : memref<8x8xf32, #tpu.memory_space<vmem>>, vector<8x8xf32>
    tpu.vector_store %arg5[%c0_14, %c0_15], %19 {strides = array<i32>} : memref<8x8xf32, #tpu.memory_space<vmem>>, vector<8x8xf32>,
    return
  }
  func.func @transform_0(%arg0: i32) -> (i32, i32) {
    %c0_i32 = arith.constant 0 : i32
    %c0_i32_0 = arith.constant 0 : i32
    return %arg0, %c0_i32 : i32, i32
  }
  func.func @transform_1(%arg0: i32) -> (i32, i32) {
    %c0_i32 = arith.constant 0 : i32
    %c0_i32_0 = arith.constant 0 : i32
    %c0_i32_1 = arith.constant 0 : i32
    return %c0_i32, %c0_i32_0 : i32, i32
  }
  func.func @transform_2(%arg0: i32) -> (i32, i32) {
    %c0_i32 = arith.constant 0 : i32
    %c0_i32_0 = arith.constant 0 : i32
    %c0_i32_1 = arith.constant 0 : i32
    return %c0_i32, %c0_i32_0 : i32, i32
  }
  func.func @transform_3(%arg0: i32) -> (i32, i32) {
    %c0_i32 = arith.constant 0 : i32
    %c0_i32_0 = arith.constant 0 : i32
    %c0_i32_1 = arith.constant 0 : i32
    return %c0_i32, %c0_i32_0 : i32, i32
  }
  func.func @transform_4(%arg0: i32) -> (i32, i32) {
    %c0_i32 = arith.constant 0 : i32
    %c0_i32_0 = arith.constant 0 : i32
    return %c0_i32, %arg0 : i32, i32
  }
}

</mosaic_0001>

<bundles_post_ra>
// kernel: tpu_custom_call.1
= control target key start
LH: loop header
LB: loop body
LE: loop exit
PB: predicated region body
PF: predicated region fallthrough
CT: control target
= control target key end

     0   :  { %9 = vsyncpa [#allocation3], 0  ;;  %s540_s0 = inlined_call_operand.vmem [shape: f32[8,32], index: 0, kind: input, shape index: {}]   ;;  %s541_s1 = inlined_call_operand.hbm [shape: f32[168,128], index: 1, kind: input, shape index: {}]   ;;  %s542_s2 = inlined_call_operand.vmem [shape: f32[2,128], index: 2, kind: input, shape index: {}]   ;;  %s543_s3 = inlined_call_operand.vmem [shape: f32[8,1], index: 3, kind: input, shape index: {}]   ;;  %s544_s4 = inlined_call_operand.hbm [shape: f32[8,8], index: 4, kind: output, shape index: {}]  }
   0x1   :  { %10 = vsyncpa [#allocation4], 0  ;;  %s468_s15 = smov [#allocation2]   ;;  %s420_s19 = scalar_lea.hbm %s541_s1, 2688 }
   0x2   :  { %s18_s16 = sshll.u32 %s468_s15, 4  ;;  %p421_p0 = scmp.ne.s32.totalorder %s541_s1, %s420_s19  ;;  %s19_s16 = int_to_ptr.vmem [resolvable:$true] %s18_s16 }
   0x3   :  { %p424_p1 = scmp.lt.u32.totalorder %s420_s19, %s541_s1 }
   0x5   :  { %p426_p2 = pnand %p424_p1, %p421_p0 }
   0x7   :  { %429 = shalt.err (!%p426_p2)
}
   0x8   :  { %s430_s24 = scalar_lea.vmem %s19_s16, 2688  ;;  %p435_p4 = scmp.lt.s32.totalorder %s19_s16, %s19_s16 }
   0x9   :  { %p431_p3 = scmp.ne.s32.totalorder %s19_s16, %s430_s24  ;;  %p436_p5 = scmp.lt.s32.totalorder %s430_s24, %s430_s24 }
   0xb   :  { %p437_p6 = por %p436_p5, %p435_p4 }
   0xd   :  { %p438_p7 = pnand %p437_p6, %p431_p3 }
   0xf   :  { %441 = shalt.err (!%p438_p7)
}
  0x10   :  { %s469_s25 = smov 128   ;;  %s470_s26 = smov 8  }
  0x11   :  { %24 = dma.hbm_to_vmem [thread:$0]  %s541_s1, 2688, %s19_s16, [#allocation3], %s469_s25, %s469_s25, %s470_s26  }
  0x12   :  { %464 = dma.done.wait [#allocation3], 2688  }
  0x13   :  { %465 = vsyncadd [#allocation3], 4294964608  ;;  %v471_v0 = vmov 0.0|0.0   ;;  %vm472_vm0 = vmmov 0   ;;  %v473_v1 = vmov 0.0   ;;  %v33_v2 = vld [vmem:[#allocation2] sm:$0xff] }
  0x14   :  { %381 = vmatprep.subr.bf16.mxu0 %v471_v0  ;;  %338 = vmatprep.mubr.msk.f32.mxu0 %vm472_vm0, %v473_v1  ;;  %v34_v3 = vld [vmem:[#allocation2 + $0x8] sm:$0xff]  ;;  %v35_v4 = vld [vmem:[#allocation2 + $0x10] sm:$0xff]  ;;  %v36_v6 = vld [vmem:[#allocation2 + $0x18] sm:$0xff]  ;;  %vm42_vm1 = vcmask 261120   ;;  %v474_v39 = vmov 0   ;;  %s475_s9 = smov [#allocation5]  }
  0x15   :  { %387 = vmatprep.subr.bf16.mxu1 %v471_v0  ;;  %373 = vmatprep.mubr.msk.f32.mxu1 %vm472_vm0, %v473_v1  ;;  %v382_v5 = vpack.c.bf16 %v34_v3, %v33_v2  ;;  %v117_v7 = vld [vmem:[#allocation2 + $0x20] sm:$0xff]  ;;  %v118_v8 = vld [vmem:[#allocation2 + $0x28] sm:$0xff]  ;;  %v119_v9 = vld [vmem:[#allocation2 + $0x30] sm:$0xff]  ;;  %v385_v11 = vpack.c.bf16 %v36_v6, %v35_v4  ;;  %s294_s10 = sshll.u32 %s475_s9, 4  ;;  %vm286_vm2 = vcmask 64512   ;;  %s295_s10 = int_to_ptr.vmem [resolvable:$true] %s294_s10 }
  0x16   :  { %v120_v10 = vld [vmem:[#allocation2 + $0x38] sm:$0xff]  ;;  %v388_v12 = vpack.c.bf16 %v118_v8, %v117_v7  ;;  %v121_v14 = vld [vmem:[#allocation2 + $0x40] sm:$0xff]  ;;  %v122_v15 = vld [vmem:[#allocation2 + $0x48] sm:$0xff]  ;;  %419 = vset.pattern.permute.xlu0 %v474_v39  ;;  %p447_p9 = scmp.lt.s32.totalorder %s295_s10, %s295_s10 }
  0x17   :  { %383 = vmatpush3.bf16.msra.mxu0 %v382_v5  ;;  %v391_v13 = vpack.c.bf16 %v120_v10, %v119_v9  ;;  %v32_v16 = vld [vmem:[%s540_s0] sm:$0xff]  ;;  %v394_v17 = vpack.c.bf16 %v122_v15, %v121_v14  ;;  %v123_v18 = vld [vmem:[#allocation2 + $0x50] sm:$0xff]  ;;  %v124_v19 = vld [vmem:[#allocation2 + $0x58] sm:$0xff] }
  0x18   :  { %384 = vmatprep.subr.bf16.mxu0 %v471_v0  ;;  %389 = vmatpush3.bf16.msra.mxu1 %v388_v12  ;;  %v397_v20 = vpack.c.bf16 %v124_v19, %v123_v18  ;;  %v125_v21 = vld [vmem:[#allocation2 + $0x60] sm:$0xff]  ;;  %v126_v22 = vld [vmem:[#allocation2 + $0x68] sm:$0xff]  ;;  %v127_v24 = vld [vmem:[#allocation2 + $0x70] sm:$0xff] }
  0x19   :  { %390 = vmatprep.subr.bf16.mxu1 %v471_v0  ;;  %v400_v23 = vpack.c.bf16 %v126_v22, %v125_v21  ;;  %v128_v25 = vld [vmem:[#allocation2 + $0x78] sm:$0xff]  ;;  %v129_v27 = vld [vmem:[#allocation2 + $0x80] sm:$0xff]  ;;  %v130_v28 = vld [vmem:[#allocation2 + $0x88] sm:$0xff] }
  0x1a   :  { %v403_v26 = vpack.c.bf16 %v128_v25, %v127_v24  ;;  %v406_v29 = vpack.c.bf16 %v130_v28, %v129_v27  ;;  %v131_v30 = vld [vmem:[#allocation2 + $0x90] sm:$0xff]  ;;  %v132_v31 = vld [vmem:[#allocation2 + $0x98] sm:$0xff]  ;;  %v303_v33 = vld [vmem:[%s542_s2] ss:$0 sm:$0xff] }
  0x1b   :  { %386 = vmatpush3.bf16.msra.mxu0 %v385_v11  ;;  %v409_v32 = vpack.c.bf16 %v132_v31, %v131_v30  ;;  %v210_v38 = vld [vmem:[%s543_s3] sm:$0xff]  ;;  %s442_s3 = scalar_lea.vmem %s295_s10, 128 }
  0x1c   :  { %376 = vmatprep.subr.mxu0 %v473_v1  ;;  %392 = vmatpush3.bf16.msra.mxu1 %v391_v13  ;;  %v305_v40 = vld [vmem:[%s542_s2 + $0x1] ss:$0 sm:$0xff]  ;;  %p443_p8 = scmp.ne.s32.totalorder %s295_s10, %s442_s3  ;;  %p448_p10 = scmp.lt.s32.totalorder %s442_s3, %s442_s3 }
  0x1d   :  { %393 = vmatprep.subr.bf16.mxu1 %v471_v0  ;;  %213 = vperm.xlu0 %419, %v210_v38   ;;  %v209_v45 = vld [vmem:[#allocation2 + $0xa0] sm:$0xff] }
  0x1e   :  { %339 = vmatmul.mubr.msk.f32.vlgmr.msra.gmra.mrb[0].mxu0 %vm42_vm1, %v32_v16  ;;  %p449_p11 = por %p448_p10, %p447_p9 }
  0x1f   :  { %378 = vmatprep.mubr.msk.f32.mxu0 %vm472_vm0, %v473_v1 }
  0x20   :  { %395 = vmatpush3.bf16.msra.mxu1 %v394_v17  ;;  %p450_p12 = pnand %p449_p11, %p443_p8 }
  0x21   :  { %396 = vmatprep.subr.bf16.mxu1 %v471_v0 }
  0x24   :  { %398 = vmatpush3.bf16.msra.mxu1 %v397_v20 }
  0x25   :  { %399 = vmatprep.subr.bf16.mxu1 %v471_v0 }
  0x28   :  { %401 = vmatpush3.bf16.msra.mxu1 %v400_v23 }
  0x29   :  { %402 = vmatprep.subr.bf16.mxu1 %v471_v0 }
  0x2c   :  { %404 = vmatpush3.bf16.msra.mxu1 %v403_v26 }
  0x2d   :  { %405 = vmatprep.subr.bf16.mxu1 %v471_v0 }
  0x30   :  { %407 = vmatpush3.bf16.msra.mxu1 %v406_v29 }
  0x31   :  { %408 = vmatprep.subr.bf16.mxu1 %v471_v0 }
  0x34   :  { %410 = vmatpush3.bf16.msra.mxu1 %v409_v32 }
  0x9c   :  { %v214_v46 = vpop.permute.xlu0 %213 }
  0xf1   :  { %v112_v34 = vpop.f32.mrb[0].mxu0 }
  0xf2   :  { %v113_v35 = vadd.f32 %v303_v33, %v112_v34  ;;  %v340_v36 = vpop.f32.mrb[1].mxu0 }
  0xf4   :  { %v116_v37 = vmax.f32 %v113_v35, 0.0 }
  0xf6   :  { %374 = vmatmul.mubr.f32.vlgmr.msra.gmra.mrb[0].mxu1 %v116_v37 }
 0x1c9   :  { %v204_v41 = vpop.f32.mrb[0].mxu1 }
 0x1ca   :  { %v205_v42 = vadd.f32 %v305_v40, %v204_v41  ;;  %v375_v43 = vpop.f32.mrb[1].mxu1 }
 0x1cc   :  { %v208_v44 = vmax.f32 %v205_v42, 0.0 }
 0x1ce   :  { %377 = vmatpush3.xpose.msra.mxu0 %v208_v44 }
 0x1d1   :  { %379 = vmatmul.mubr.f32.vlgmr.msra.gmra.mrb[2].mxu0 %v209_v45 }
 0x2a4   :  { %v282_v47 = vpop.f32.mrb[2].mxu0 }
 0x2a5   :  { %v283_v48 = vadd.f32 %v282_v47, %v214_v46  ;;  %v380_v49 = vpop.f32.mrb[3].mxu0 }
 0x2a7   :  { %287 = vst.msk [vmem:[#allocation5] sm:$0xff] %vm286_vm2, %v283_v48 }
 0x2a8   :  { %453 = shalt.err (!%p450_p12)
}
 0x2a9   :  { %s454_s12 = scalar_lea.hbm %s544_s4, 128 }
 0x2aa   :  { %p455_p13 = scmp.ne.s32.totalorder %s544_s4, %s454_s12  ;;  %p458_p0 = scmp.lt.u32.totalorder %s454_s12, %s544_s4 }
 0x2ac   :  { %p460_p1 = pnand %p458_p0, %p455_p13 }
 0x2ae   :  { %463 = shalt.err (!%p460_p1)
}
 0x2af   :  { %297 = dma.vmem_to_hbm [thread:$0]  %s295_s10, 128, %s544_s4, [#allocation4]  }
 0x2b0   :  { %466 = dma.done.wait [#allocation4], 128  }
 0x2b1   :  { %467 = vsyncadd [#allocation4], 4294967168 }
 0x2b2   :  { %301 = vsyncpa [#allocation3], 1 }
 0x2b3   :  { %302 = vsyncpa [#allocation4], 1 }

</bundles_post_ra>
